<compile_context>
chip_gen: v5e
topology: v5e:2x2
jax: 0.10.0
libtpu: 0.0.40
codegen_flags: <defaults>
</compile_context>

<pallas_src>
import jax
import jax.numpy as jnp
from jax.experimental import pallas as pl
from jax.experimental.pallas import tpu as pltpu


# -----------------------------------------------------------------------------
# Kernel: batch lives on the 128-lane axis.
#   xt : (K, tile_b)       x^T tile
#   w1 : (H, K)            PyTorch-native (out, in)
#   b1 : (H, 1)
#   w2 : (2*out, H)
#   b2 : (2*out, 1)
#   yt : (2*out, tile_b)   y^T tile  (lane-dense, unmasked stores)
# -----------------------------------------------------------------------------
def _encoder_kernel(xt_ref, w1_ref, b1_ref, w2_ref, b2_ref, yt_ref):
    # fc1: h^T = relu(W1 @ x^T + b1).  MXU with f32 accumulation; N-dim = tile_b.
    h = jnp.dot(w1_ref[...], xt_ref[...], preferred_element_type=jnp.float32)
    h = jnp.maximum(h + b1_ref[...].astype(jnp.float32), 0.0)

    # fc2: y^T = W2 @ h^T + b2.  Cast h to the weight dtype (no-op for f32,
    # enables the bf16 MXU path for bf16 weights) but keep f32 accumulation.
    y = jnp.dot(w2_ref[...], h.astype(w2_ref.dtype),
                preferred_element_type=jnp.float32)
    y = y + b2_ref[...].astype(jnp.float32)

    # Lane-dense store: last dim is tile_b (>=128 when tiled), not 2*out.
    yt_ref[...] = y.astype(yt_ref.dtype)


def _round_up(v, m):
    return -(-v // m) * m


def _reference_forward(x, w1, b1, w2, b2):
    """Plain XLA path (also the small-batch bypass)."""
    h = jnp.maximum(x @ w1.T + b1.reshape(1, -1), 0.0)
    y = h @ w2.T + b2.reshape(1, -1)
    mu, logvar = jnp.split(y, 2, axis=1)
    return mu, logvar


def encoder_forward(x, w1, b1, w2, b2, *, max_tile_b=4096,
                    min_pallas_batch=512, force_pallas=False):
    """x: (B, input_size); w1: (hidden, input_size); b1: (hidden, 1);
    w2: (2*output, hidden); b2: (2*output, 1).
    Returns (mu, logvar), each (B, output_size)."""
    B, K = x.shape
    H = w1.shape[0]
    two_out = w2.shape[0]

    # Small-problem bypass: at tiny batch the kernel is 100% launch overhead.
    if B < min_pallas_batch and not force_pallas:
        return _reference_forward(x, w1, b1, w2, b2)

    # ---- batch tile selection (batch is on the lane axis -> 128 alignment) --
    LANE = 128
    if B <= LANE:
        tile_b = B                                   # single full-width tile
    else:
        # Aim for >=2 grid steps (megacore sharding on v7x) with 128-aligned
        # tiles; cap by max_tile_b.
        tile_b = min(max_tile_b, _round_up(pl.cdiv(B, 2), LANE))

    # ---- VMEM budget check (only matters if the layer ever grows) -----------
    itemsize = jnp.dtype(x.dtype).itemsize

    def vmem_bytes(tb):
        weights = 2 * (H * K + H + two_out * H + two_out) * itemsize
        x_buf = 3 * tb * K * itemsize            # Buffered(3) input tiles
        y_buf = 2 * tb * two_out * itemsize      # double-buffered output tiles
        return weights + x_buf + y_buf

    VMEM_BUDGET = 24 * 1024 * 1024               # headroom vs. 32 MiB scoped
    while tile_b > LANE and vmem_bytes(tile_b) > VMEM_BUDGET:
        tile_b = max(LANE, _round_up(tile_b // 2, LANE))

    grid = (pl.cdiv(B, tile_b),)

    # Advisory cost hint for the XLA scheduler.
    flops = 2 * B * (K * H + H * two_out)
    bytes_accessed = (
        sum(int(a.size) * a.dtype.itemsize for a in (x, w1, b1, w2, b2))
        + B * two_out * x.dtype.itemsize
    )
    cost = pl.CostEstimate(flops=flops, transcendentals=0,
                           bytes_accessed=bytes_accessed)

    # Deeper pipelining on the streamed activations (pure-streaming kernel).
    x_spec_kwargs = {}
    if grid[0] > 1:
        x_spec_kwargs["pipeline_mode"] = pl.Buffered(3)

    # Batch onto the lane axis (cheap XLA transpose; x is only B*K*4 bytes).
    xt = x.T                                         # (K, B)

    yt = pl.pallas_call(
        _encoder_kernel,
        out_shape=jax.ShapeDtypeStruct((two_out, B), x.dtype),
        grid_spec=pltpu.PrefetchScalarGridSpec(
            num_scalar_prefetch=0,
            grid=grid,
            in_specs=[
                # Activations streamed over the batch (lane) axis.
                pl.BlockSpec((K, tile_b), lambda i: (0, i), **x_spec_kwargs),
                # Weights / biases pinned in VMEM (constant index_map).
                pl.BlockSpec(w1.shape, lambda i: (0, 0)),
                pl.BlockSpec(b1.shape, lambda i: (0, 0)),
                pl.BlockSpec(w2.shape, lambda i: (0, 0)),
                pl.BlockSpec(b2.shape, lambda i: (0, 0)),
            ],
            out_specs=pl.BlockSpec((two_out, tile_b), lambda i: (0, i)),
        ),
        compiler_params=pltpu.CompilerParams(
            dimension_semantics=("parallel",),       # shard tiles across TCs (v7x)
            vmem_limit_bytes=32 * 1024 * 1024,
        ),
        cost_estimate=cost,
    )(xt, w1, b1, w2, b2)

    # th.chunk(y, 2, dim=1) + un-transpose done outside the kernel (free slices).
    mu_t, logvar_t = jnp.split(yt, 2, axis=0)
    return mu_t.T, logvar_t.T


def make_params(key, input_size, output_size, dtype=jnp.float32):
    hidden_size = (input_size + output_size * 2) // 2
    k1, k2, k3, k4 = jax.random.split(key, 4)
    # PyTorch-native Linear layouts: weight (out, in); bias stored as a column
    # (out, 1) so it broadcasts over the lane (batch) axis inside the kernel.
    w1 = jax.random.normal(k1, (hidden_size, input_size), dtype) * 0.1
    b1 = jax.random.normal(k2, (hidden_size, 1), dtype) * 0.1
    w2 = jax.random.normal(k3, (2 * output_size, hidden_size), dtype) * 0.1
    b2 = jax.random.normal(k4, (2 * output_size, 1), dtype) * 0.1
    return w1, b1, w2, b2


if __name__ == "__main__":
    input_size = 32
    output_size = 8

    key = jax.random.PRNGKey(0)
    kp, kx1, kx2, kx3 = jax.random.split(key, 4)
    w1, b1, w2, b2 = make_params(kp, input_size, output_size)

    # --- 1) Module-spec small shape (batch=2): force the Pallas path so the
    #        kernel itself runs at least once at the spec size (grid = 1).
    x_small = jax.random.normal(kx1, (2, input_size), jnp.float32)
    mu, logvar = encoder_forward(x_small, w1, b1, w2, b2, force_pallas=True)
    jax.block_until_ready((mu, logvar))
    mu_ref, lv_ref = _reference_forward(x_small, w1, b1, w2, b2)
    assert mu.shape == (2, output_size) and logvar.shape == (2, output_size)
    assert jnp.allclose(mu, mu_ref, atol=1e-5), "mu mismatch (small batch)"
    assert jnp.allclose(logvar, lv_ref, atol=1e-5), "logvar mismatch (small batch)"

    # --- 2) Batched run: two 128-aligned lane tiles (384 + partial), exercises
    #        megacore sharding on v7x, Buffered(3) input pipeline, OOB masking.
    x_big = jax.random.normal(kx2, (640, input_size), jnp.float32)
    mu_b, lv_b = encoder_forward(x_big, w1, b1, w2, b2)
    jax.block_until_ready((mu_b, lv_b))
    mu_b_ref, lv_b_ref = _reference_forward(x_big, w1, b1, w2, b2)
    assert jnp.allclose(mu_b, mu_b_ref, atol=1e-4), "mu mismatch (tiled batch)"
    assert jnp.allclose(lv_b, lv_b_ref, atol=1e-4), "logvar mismatch (tiled batch)"

    # --- 3) Force a >2-step grid (tile cap 256 -> grid of 3) to exercise the
    #        streamed-input pipeline over several steps.
    x_tiled = jax.random.normal(kx3, (640, input_size), jnp.float32)
    mu_t, lv_t = encoder_forward(x_tiled, w1, b1, w2, b2, max_tile_b=256)
    jax.block_until_ready((mu_t, lv_t))
    mu_t_ref, lv_t_ref = _reference_forward(x_tiled, w1, b1, w2, b2)
    assert jnp.allclose(mu_t, mu_t_ref, atol=1e-4), "mu mismatch (3-step grid)"
    assert jnp.allclose(lv_t, lv_t_ref, atol=1e-4), "logvar mismatch (3-step grid)"

    print("KERNEL_OK")
</pallas_src>

<mosaic_0001>
module attributes {stable_mosaic.version = 11 : i64} {
  func.func @_encoder_kernel(%arg0: i32, %arg1: memref<32x2xf32, #tpu.memory_space<vmem>>, %arg2: memref<24x32xf32, #tpu.memory_space<vmem>>, %arg3: memref<24x1xf32, #tpu.memory_space<vmem>>, %arg4: memref<16x24xf32, #tpu.memory_space<vmem>>, %arg5: memref<16x1xf32, #tpu.memory_space<vmem>>, %arg6: memref<16x2xf32, #tpu.memory_space<vmem>>) attributes {dimension_semantics = [#tpu.dimension_semantics<parallel>], iteration_bounds = array<i64: 1>, scalar_prefetch = 0 : i64, scratch_operands = 0 : i64, tpu.core_type = #tpu.core_type<tc>, window_params = [{transform_indices = @transform_0, window_bounds = array<i64: 32, 2>}, {pipeline_mode = #tpu.pipeline_mode<synchronous>, transform_indices = @transform_1, window_bounds = array<i64: 24, 32>}, {pipeline_mode = #tpu.pipeline_mode<synchronous>, transform_indices = @transform_2, window_bounds = array<i64: 24, 1>}, {pipeline_mode = #tpu.pipeline_mode<synchronous>, transform_indices = @transform_3, window_bounds = array<i64: 16, 24>}, {pipeline_mode = #tpu.pipeline_mode<synchronous>, transform_indices = @transform_4, window_bounds = array<i64: 16, 1>}, {transform_indices = @transform_5, window_bounds = array<i64: 16, 2>}]} {
    %c0 = arith.constant 0 : index
    %c0_0 = arith.constant 0 : index
    %0 = vector.load %arg2[%c0, %c0_0] : memref<24x32xf32, #tpu.memory_space<vmem>>, vector<24x32xf32>
    %c0_1 = arith.constant 0 : index
    %c0_2 = arith.constant 0 : index
    %1 = vector.load %arg1[%c0_1, %c0_2] : memref<32x2xf32, #tpu.memory_space<vmem>>, vector<32x2xf32>
    %cst = arith.constant dense<0.000000e+00> : vector<24x2xf32>
    %2 = tpu.matmul %0, %1, %cst {dimension_numbers = #tpu.dot_dimension_numbers<[1], [0], [0], [1], [0, 0, 1, 1], [], []>} : vector<24x32xf32>, vector<32x2xf32>, vector<24x2xf32> -> vector<24x2xf32>
    %c0_3 = arith.constant 0 : index
    %c0_4 = arith.constant 0 : index
    %3 = vector.load %arg3[%c0_3, %c0_4] : memref<24x1xf32, #tpu.memory_space<vmem>>, vector<24x1xf32>
    %4 = vector.broadcast %3 : vector<24x1xf32> to vector<24x2xf32>
    %5 = arith.addf %2, %4 : vector<24x2xf32>
    %cst_5 = arith.constant 0.000000e+00 : f32
    %6 = vector.broadcast %cst_5 : f32 to vector<24x2xf32>
    %7 = arith.maximumf %5, %6 : vector<24x2xf32>
    %c0_6 = arith.constant 0 : index
    %c0_7 = arith.constant 0 : index
    %8 = vector.load %arg4[%c0_6, %c0_7] : memref<16x24xf32, #tpu.memory_space<vmem>>, vector<16x24xf32>
    %cst_8 = arith.constant dense<0.000000e+00> : vector<16x2xf32>
    %9 = tpu.matmul %8, %7, %cst_8 {dimension_numbers = #tpu.dot_dimension_numbers<[1], [0], [0], [1], [0, 0, 1, 1], [], []>} : vector<16x24xf32>, vector<24x2xf32>, vector<16x2xf32> -> vector<16x2xf32>
    %c0_9 = arith.constant 0 : index
    %c0_10 = arith.constant 0 : index
    %10 = vector.load %arg5[%c0_9, %c0_10] : memref<16x1xf32, #tpu.memory_space<vmem>>, vector<16x1xf32>
    %11 = vector.broadcast %10 : vector<16x1xf32> to vector<16x2xf32>
    %12 = arith.addf %9, %11 : vector<16x2xf32>
    %c0_11 = arith.constant 0 : index
    %c0_12 = arith.constant 0 : index
    %13 = vector.load %arg6[%c0_11, %c0_12] : memref<16x2xf32, #tpu.memory_space<vmem>>, vector<16x2xf32>
    tpu.vector_store %arg6[%c0_11, %c0_12], %12 {strides = array<i32>} : memref<16x2xf32, #tpu.memory_space<vmem>>, vector<16x2xf32>,
    return
  }
  func.func @transform_0(%arg0: i32) -> (i32, i32) {
    %c0_i32 = arith.constant 0 : i32
    %c0_i32_0 = arith.constant 0 : i32
    return %c0_i32, %arg0 : i32, i32
  }
  func.func @transform_1(%arg0: i32) -> (i32, i32) {
    %c0_i32 = arith.constant 0 : i32
    %c0_i32_0 = arith.constant 0 : i32
    %c0_i32_1 = arith.constant 0 : i32
    return %c0_i32, %c0_i32_0 : i32, i32
  }
  func.func @transform_2(%arg0: i32) -> (i32, i32) {
    %c0_i32 = arith.constant 0 : i32
    %c0_i32_0 = arith.constant 0 : i32
    %c0_i32_1 = arith.constant 0 : i32
    return %c0_i32, %c0_i32_0 : i32, i32
  }
  func.func @transform_3(%arg0: i32) -> (i32, i32) {
    %c0_i32 = arith.constant 0 : i32
    %c0_i32_0 = arith.constant 0 : i32
    %c0_i32_1 = arith.constant 0 : i32
    return %c0_i32, %c0_i32_0 : i32, i32
  }
  func.func @transform_4(%arg0: i32) -> (i32, i32) {
    %c0_i32 = arith.constant 0 : i32
    %c0_i32_0 = arith.constant 0 : i32
    %c0_i32_1 = arith.constant 0 : i32
    return %c0_i32, %c0_i32_0 : i32, i32
  }
  func.func @transform_5(%arg0: i32) -> (i32, i32) {
    %c0_i32 = arith.constant 0 : i32
    %c0_i32_0 = arith.constant 0 : i32
    return %c0_i32, %arg0 : i32, i32
  }
}

</mosaic_0001>

<bundles_post_ra>
// kernel: tpu_custom_call.1
= control target key start
LH: loop header
LB: loop body
LE: loop exit
PB: predicated region body
PF: predicated region fallthrough
CT: control target
= control target key end

     0   :  { %v152_v2 = vmov 0   ;;  %vm45_vm0 = vcmask 261120   ;;  %vm98_vm1 = vcmask 195584   ;;  %vm128_vm2 = vcmask 15360   ;;  %s231_s0 = inlined_call_operand.vmem [shape: f32[32,2], index: 0, kind: input, shape index: {}]   ;;  %s232_s2 = inlined_call_operand.vmem [shape: f32[24,1], index: 2, kind: input, shape index: {}]   ;;  %s233_s1 = inlined_call_operand.vmem [shape: f32[24,32], index: 1, kind: input, shape index: {}]   ;;  %s234_s4 = inlined_call_operand.vmem [shape: f32[16,1], index: 4, kind: input, shape index: {}]   ;;  %s235_s3 = inlined_call_operand.vmem [shape: f32[16,24], index: 3, kind: input, shape index: {}]   ;;  %s236_s5 = inlined_call_operand.vmem [shape: f32[16,2], index: 5, kind: output, shape index: {}]  }
   0x1   :  { %v26_v0 = vld [vmem:[%s231_s0 + $0x18] sm:$0xff]  ;;  %v25_v1 = vld [vmem:[%s231_s0 + $0x10] sm:$0xff]  ;;  %149 = vset.pattern.permute.xlu0 %v152_v2  ;;  %150 = vset.pattern.permute.xlu1 %v152_v2  ;;  %v24_v3 = vld [vmem:[%s231_s0 + $0x8] sm:$0xff] }
   0x2   :  { %140 = vmatpush.msra.mxu2 %v26_v0  ;;  %141 = vmatpush.msra.mxu3 %v26_v0  ;;  %v29_v4 = vld [vmem:[%s232_s2 + $0x10] sm:$0xff]  ;;  %v27_v5 = vld [vmem:[%s232_s2] sm:$0xff]  ;;  %v21_v7 = vld [vmem:[%s233_s1 + $0x8] sm:$0xff] }
   0x3   :  { %67 = vmatpush.msra.mxu0 %v26_v0  ;;  %151 = vset.pattern.permute.xlu2 %v152_v2  ;;  %v23_v6 = vld [vmem:[%s231_s0] sm:$0xff]  ;;  %v22_v8 = vld [vmem:[%s233_s1 + $0x10] sm:$0xff]  ;;  %v28_v10 = vld [vmem:[%s232_s2 + $0x8] sm:$0xff] }
   0x4   :  { %142 = vmatpush.msra.mxu2 %v25_v1  ;;  %143 = vmatpush.msra.mxu3 %v25_v1  ;;  %v20_v9 = vld [vmem:[%s233_s1] sm:$0xff]  ;;  %v87_v12 = vld [vmem:[%s234_s4 + $0x8] sm:$0xff] }
   0x5   :  { %42 = vperm.xlu0 %149, %v29_v4   ;;  %68 = vmatpush.msra.mxu0 %v25_v1  ;;  %v86_v11 = vld [vmem:[%s234_s4] sm:$0xff]  ;;  %v85_v26 = vld [vmem:[%s235_s3 + $0x8] sm:$0xff] }
   0x6   :  { %144 = vmatpush.msra.mxu2 %v24_v3  ;;  %145 = vmatpush.msra.mxu3 %v24_v3  ;;  %v84_v25 = vld [vmem:[%s235_s3] sm:$0xff] }
   0x7   :  { %69 = vmatpush.msra.mxu0 %v24_v3  ;;  %32 = vperm.xlu1 %150, %v27_v5  }
   0x8   :  { %146 = vmatpush.msra.mxu2 %v23_v6  ;;  %147 = vmatpush.msra.mxu3 %v23_v6 }
   0x9   :  { %136 = vmatmul.msk.f32.vlgmr.msra.gmra.mxu2 %vm45_vm0, %v21_v7  ;;  %137 = vmatmul.msk.f32.vlgmr.msra.gmra.mxu3 %vm45_vm0, %v22_v8 }
   0xa   :  { %70 = vmatpush.msra.mxu0 %v23_v6  ;;  %95 = vperm.xlu2 %151, %v87_v12  }
   0xb   :  { %135 = vmatmul.msk.f32.vlgmr.msra.gmra.mxu0 %vm45_vm0, %v20_v9 }
   0xd   :  { %37 = vperm.xlu0 %149, %v28_v10  }
   0xf   :  { %90 = vperm.xlu1 %150, %v86_v11  }
  0x64   :  { %v96_v30 = vpop.permute.xlu2 %95 }
  0x77   :  { %v43_v13 = vpop.permute.xlu0 %42 }
  0x79   :  { %v33_v16 = vpop.permute.xlu1 %32 }
  0x7f   :  { %v38_v15 = vpop.permute.xlu0 %37 }
  0x81   :  { %v91_v27 = vpop.permute.xlu1 %90 }
  0x88   :  { %v72_v14 = vpop.f32.mrf.mxu0 }
  0x89   :  { %v73_v20 = vadd.f32 %v72_v14, %v33_v16 }
  0x8b   :  { %v81_v24 = vmax.f32 %v73_v20, 0.0 }
  0x8c   :  { %v75_v17 = vpop.f32.mrf.mxu2  ;;  %v78_v18 = vpop.f32.mrf.mxu3 }
  0x8d   :  { %v76_v19 = vadd.f32 %v75_v17, %v38_v15  ;;  %v79_v21 = vadd.f32 %v78_v18, %v43_v13 }
  0x8f   :  { %v83_v22 = vmax.f32 %v79_v21, 0.0  ;;  %v82_v23 = vmax.f32 %v76_v19, 0.0 }
  0x91   :  { %118 = vmatpush.msra.mxu1 %v83_v22 }
  0x93   :  { %119 = vmatpush.msra.mxu1 %v82_v23 }
  0x95   :  { %120 = vmatpush.msra.mxu1 %v81_v24 }
  0x96   :  { %138 = vmatmul.msk.f32.vlgmr.msra.gmra.mxu1 %vm98_vm1, %v84_v25 }
  0x9e   :  { %139 = vmatmul.msk.f32.gmra.mxu1 %vm98_vm1, %v85_v26 }
 0x113   :  { %v122_v28 = vpop.f32.mrf.mxu1 }
 0x114   :  { %v123_v29 = vadd.f32 %v122_v28, %v91_v27 }
 0x116   :  { %129 = vst.msk [vmem:[%s236_s5] sm:$0xff] %vm128_vm2, %v123_v29 }
 0x11b   :  { %v125_v31 = vpop.f32.mrf.mxu1 }
 0x11c   :  { %v126_v32 = vadd.f32 %v125_v31, %v96_v30 }
 0x11e   :  { %130 = vst.msk [vmem:[%s236_s5 + $0x8] sm:$0xff] %vm128_vm2, %v126_v32 }

</bundles_post_ra>
